<compile_context>
chip_gen: v7x
topology: tpu7x:2x2x1
jax: 0.10.0
libtpu: 0.0.40
codegen_flags: <defaults>
</compile_context>

<pallas_src>
import functools

import jax
import jax.numpy as jnp
from jax.experimental import pallas as pl
from jax.experimental.pallas import tpu as pltpu


def _se_weight_kernel(x_ref, w1t_ref, b1_ref, w2t_ref, b2_ref, o_ref, acc_ref,
                      *, hw_total, thw):
    """Grid = (batch tiles, HW tiles).  HW is the reduction axis (last)."""
    j = pl.program_id(1)

    # Zero the running-sum accumulator at the first HW step of this batch tile.
    @pl.when(j == 0)
    def _():
        acc_ref[...] = jnp.zeros_like(acc_ref)

    x = x_ref[...]                                        # (TN, C, THW)

    # Mask the tail HW tile if H*W is not a multiple of THW (compile-time
    # branch: no masking cost when the split is exact).
    if hw_total % thw != 0:
        lane = jax.lax.broadcasted_iota(jnp.int32, x.shape, dimension=2)
        x = jnp.where(j * thw + lane < hw_total, x, jnp.zeros_like(x))

    # Running sum over spatial positions (f32 accumulation).
    acc_ref[...] += jnp.sum(x.astype(jnp.float32), axis=-1)

    # On the last HW step: finish the mean, run fc1/ReLU/fc2/sigmoid, store.
    @pl.when(j == pl.num_programs(1) - 1)
    def _():
        pooled = acc_ref[...] * jnp.float32(1.0 / hw_total)           # (TN, C)
        h = jnp.dot(pooled, w1t_ref[...],
                    preferred_element_type=jnp.float32) + b1_ref[...]  # (TN, Cr)
        h = jnp.maximum(h, 0.0)                                        # ReLU
        out = jnp.dot(h, w2t_ref[...],
                      preferred_element_type=jnp.float32) + b2_ref[...]  # (TN, C)
        o_ref[...] = jax.nn.sigmoid(out).astype(o_ref.dtype)


def se_weight_module(x, w1, b1, w2, b2, *, tn=8, thw=512):
    """SEWeightModule forward.

    x : (N, C, H, W) float32
    w1: (C//r, C)   b1: (C//r,)     -- fc1 (1x1 conv)
    w2: (C, C//r)   b2: (C,)        -- fc2 (1x1 conv)
    Returns (N, C, 1, 1), matching the PyTorch module.
    """
    N, C, H, W = x.shape
    Cr = w1.shape[0]
    HW = H * W
    x_flat = x.reshape(N, C, HW)

    # Pre-transpose weights once so the kernel contracts directly on the MXU.
    w1t = jnp.transpose(w1)          # (C, Cr)
    w2t = jnp.transpose(w2)          # (Cr, C)
    b1r = b1.reshape(1, Cr)
    b2r = b2.reshape(1, C)

    # Batch tile.
    tn = min(tn, N)
    # HW tile: full extent if it fits, else a multiple of 128 (lane-dense).
    if HW <= thw:
        thw_blk = HW
    else:
        thw_blk = max(128, (thw // 128) * 128)

    grid = (pl.cdiv(N, tn), pl.cdiv(HW, thw_blk))

    kernel = functools.partial(_se_weight_kernel, hw_total=HW, thw=thw_blk)

    out = pl.pallas_call(
        kernel,
        out_shape=jax.ShapeDtypeStruct((N, C), x.dtype),
        grid_spec=pltpu.PrefetchScalarGridSpec(
            num_scalar_prefetch=0,
            grid=grid,
            in_specs=[
                # x: tiled over batch and HW.
                pl.BlockSpec((tn, C, thw_blk), lambda i, j: (i, 0, j)),
                # Weights / biases: full blocks, resident across the grid.
                pl.BlockSpec((C, Cr), lambda i, j: (0, 0)),
                pl.BlockSpec((1, Cr), lambda i, j: (0, 0)),
                pl.BlockSpec((Cr, C), lambda i, j: (0, 0)),
                pl.BlockSpec((1, C), lambda i, j: (0, 0)),
            ],
            # Output block index is constant across the HW axis -> resident
            # accumulator-style output, written only at the last HW step.
            out_specs=pl.BlockSpec((tn, C), lambda i, j: (i, 0)),
            scratch_shapes=[pltpu.VMEM((tn, C), jnp.float32)],
        ),
        compiler_params=pltpu.CompilerParams(
            # batch axis parallel (uses both TCs on v7x), HW reduction arbitrary.
            dimension_semantics=("parallel", "arbitrary"),
            # Raise the scoped-VMEM limit (default 16/32 MiB) while staying
            # under v7x's 64 MiB physical VMEM.
            vmem_limit_bytes=48 * 1024 * 1024,
        ),
    )(x_flat, w1t, b1r, w2t, b2r)

    return out.reshape(N, C, 1, 1)


def se_weight_ref(x, w1, b1, w2, b2):
    """Pure-JAX reference mirroring the PyTorch forward."""
    pooled = jnp.mean(x, axis=(2, 3))                       # (N, C)
    h = jnp.maximum(pooled @ w1.T + b1, 0.0)                # (N, Cr)
    out = jax.nn.sigmoid(h @ w2.T + b2)                     # (N, C)
    return out[:, :, None, None]


if __name__ == "__main__":
    # Channels must be divisible by reduction (default 16).
    N, C = 2, 32
    reduction = 16
    Cr = C // reduction

    key = jax.random.PRNGKey(0)
    kx, kw1, kb1, kw2, kb2, kx2 = jax.random.split(key, 6)

    w1 = jax.random.normal(kw1, (Cr, C), dtype=jnp.float32) * 0.1
    b1 = jax.random.normal(kb1, (Cr,), dtype=jnp.float32) * 0.1
    w2 = jax.random.normal(kw2, (C, Cr), dtype=jnp.float32) * 0.1
    b2 = jax.random.normal(kb2, (C,), dtype=jnp.float32) * 0.1

    # Primary test: H*W divides the HW tile exactly (2 reduction steps).
    H, W = 16, 16
    x = jax.random.normal(kx, (N, C, H, W), dtype=jnp.float32)
    out = jax.block_until_ready(se_weight_module(x, w1, b1, w2, b2, thw=128))
    ref = se_weight_ref(x, w1, b1, w2, b2)
    assert out.shape == (N, C, 1, 1), out.shape
    assert jnp.allclose(out, ref, atol=1e-5, rtol=1e-5), \
        float(jnp.max(jnp.abs(out - ref)))

    # Second test: H*W NOT a multiple of the HW tile -> exercises tail masking.
    H2, W2 = 10, 30  # HW = 300, thw = 128 -> 3 tiles, last one masked
    x2 = jax.random.normal(kx2, (N, C, H2, W2), dtype=jnp.float32)
    out2 = jax.block_until_ready(se_weight_module(x2, w1, b1, w2, b2, thw=128))
    ref2 = se_weight_ref(x2, w1, b1, w2, b2)
    assert out2.shape == (N, C, 1, 1), out2.shape
    assert jnp.allclose(out2, ref2, atol=1e-5, rtol=1e-5), \
        float(jnp.max(jnp.abs(out2 - ref2)))

    print("KERNEL_OK")
</pallas_src>

<mosaic_0001>
module attributes {stable_mosaic.version = 11 : i64} {
  func.func @_se_weight_kernel(%arg0: i32, %arg1: i32, %arg2: memref<2x32x128xf32, #tpu.memory_space<vmem>>, %arg3: memref<32x2xf32, #tpu.memory_space<vmem>>, %arg4: memref<1x2xf32, #tpu.memory_space<vmem>>, %arg5: memref<2x32xf32, #tpu.memory_space<vmem>>, %arg6: memref<1x32xf32, #tpu.memory_space<vmem>>, %arg7: memref<2x32xf32, #tpu.memory_space<vmem>>, %arg8: memref<2x32xf32, #tpu.memory_space<vmem>>) attributes {dimension_semantics = [#tpu.dimension_semantics<parallel>, #tpu.dimension_semantics<arbitrary>], iteration_bounds = array<i64: 1, 2>, scalar_prefetch = 0 : i64, scratch_operands = 1 : i64, tpu.core_type = #tpu.core_type<tc>, window_params = [{transform_indices = @transform_0, window_bounds = array<i64: 2, 32, 128>}, {pipeline_mode = #tpu.pipeline_mode<synchronous>, transform_indices = @transform_1, window_bounds = array<i64: 32, 2>}, {pipeline_mode = #tpu.pipeline_mode<synchronous>, transform_indices = @transform_2, window_bounds = array<i64: 1, 2>}, {pipeline_mode = #tpu.pipeline_mode<synchronous>, transform_indices = @transform_3, window_bounds = array<i64: 2, 32>}, {pipeline_mode = #tpu.pipeline_mode<synchronous>, transform_indices = @transform_4, window_bounds = array<i64: 1, 32>}, {transform_indices = @transform_5, window_bounds = array<i64: 2, 32>}]} {
    %c0_i32 = arith.constant 0 : i32
    %0 = arith.cmpi eq, %arg1, %c0_i32 : i32
    %1 = arith.extui %0 : i1 to i32
    %c0_i32_0 = arith.constant 0 : i32
    %2 = arith.cmpi ne, %1, %c0_i32_0 : i32
    scf.if %2 {
      %cst_8 = arith.constant 0.000000e+00 : f32
      %11 = vector.broadcast %cst_8 : f32 to vector<2x32xf32>
      %c0_9 = arith.constant 0 : index
      %c0_10 = arith.constant 0 : index
      %12 = vector.load %arg8[%c0_9, %c0_10] : memref<2x32xf32, #tpu.memory_space<vmem>>, vector<2x32xf32>
      tpu.vector_store %arg8[%c0_9, %c0_10], %11 {strides = array<i32>} : memref<2x32xf32, #tpu.memory_space<vmem>>, vector<2x32xf32>,
    } else {
    }
    %c0 = arith.constant 0 : index
    %c0_1 = arith.constant 0 : index
    %c0_2 = arith.constant 0 : index
    %3 = vector.load %arg2[%c0, %c0_1, %c0_2] : memref<2x32x128xf32, #tpu.memory_space<vmem>>, vector<2x32x128xf32>
    %c0_3 = arith.constant 0 : index
    %c0_4 = arith.constant 0 : index
    %4 = vector.load %arg8[%c0_3, %c0_4] : memref<2x32xf32, #tpu.memory_space<vmem>>, vector<2x32xf32>
    %cst = arith.constant dense<0.000000e+00> : vector<2x32xf32>
    %5 = vector.multi_reduction <add>, %3, %cst [2] : vector<2x32x128xf32> to vector<2x32xf32>
    %6 = arith.addf %4, %5 : vector<2x32xf32>
    %c0_5 = arith.constant 0 : index
    %c0_6 = arith.constant 0 : index
    %7 = vector.load %arg8[%c0_5, %c0_6] : memref<2x32xf32, #tpu.memory_space<vmem>>, vector<2x32xf32>
    tpu.vector_store %arg8[%c0_5, %c0_6], %6 {strides = array<i32>} : memref<2x32xf32, #tpu.memory_space<vmem>>, vector<2x32xf32>,
    %c1_i32 = arith.constant 1 : i32
    %8 = arith.cmpi eq, %arg1, %c1_i32 : i32
    %9 = arith.extui %8 : i1 to i32
    %c0_i32_7 = arith.constant 0 : i32
    %10 = arith.cmpi ne, %9, %c0_i32_7 : i32
    scf.if %10 {
      %c0_8 = arith.constant 0 : index
      %c0_9 = arith.constant 0 : index
      %11 = vector.load %arg8[%c0_8, %c0_9] : memref<2x32xf32, #tpu.memory_space<vmem>>, vector<2x32xf32>
      %cst_10 = arith.constant 3.906250e-03 : f32
      %12 = vector.broadcast %cst_10 : f32 to vector<2x32xf32>
      %13 = arith.mulf %11, %12 : vector<2x32xf32>
      %c0_11 = arith.constant 0 : index
      %c0_12 = arith.constant 0 : index
      %14 = vector.load %arg3[%c0_11, %c0_12] : memref<32x2xf32, #tpu.memory_space<vmem>>, vector<32x2xf32>
      %cst_13 = arith.constant dense<0.000000e+00> : vector<2x2xf32>
      %15 = tpu.matmul %13, %14, %cst_13 {dimension_numbers = #tpu.dot_dimension_numbers<[1], [0], [0], [1], [0, 0, 1, 1], [], []>} : vector<2x32xf32>, vector<32x2xf32>, vector<2x2xf32> -> vector<2x2xf32>
      %c0_14 = arith.constant 0 : index
      %c0_15 = arith.constant 0 : index
      %16 = vector.load %arg4[%c0_14, %c0_15] : memref<1x2xf32, #tpu.memory_space<vmem>>, vector<1x2xf32>
      %17 = vector.broadcast %16 : vector<1x2xf32> to vector<2x2xf32>
      %18 = arith.addf %15, %17 : vector<2x2xf32>
      %cst_16 = arith.constant 0.000000e+00 : f32
      %19 = vector.broadcast %cst_16 : f32 to vector<2x2xf32>
      %20 = arith.maximumf %18, %19 : vector<2x2xf32>
      %c0_17 = arith.constant 0 : index
      %c0_18 = arith.constant 0 : index
      %21 = vector.load %arg5[%c0_17, %c0_18] : memref<2x32xf32, #tpu.memory_space<vmem>>, vector<2x32xf32>
      %cst_19 = arith.constant dense<0.000000e+00> : vector<2x32xf32>
      %22 = tpu.matmul %20, %21, %cst_19 {dimension_numbers = #tpu.dot_dimension_numbers<[1], [0], [0], [1], [0, 0, 1, 1], [], []>} : vector<2x2xf32>, vector<2x32xf32>, vector<2x32xf32> -> vector<2x32xf32>
      %c0_20 = arith.constant 0 : index
      %c0_21 = arith.constant 0 : index
      %23 = vector.load %arg6[%c0_20, %c0_21] : memref<1x32xf32, #tpu.memory_space<vmem>>, vector<1x32xf32>
      %24 = vector.broadcast %23 : vector<1x32xf32> to vector<2x32xf32>
      %25 = arith.addf %22, %24 : vector<2x32xf32>
      %26 = arith.negf %25 : vector<2x32xf32>
      %27 = math.exp %26 : vector<2x32xf32>
      %cst_22 = arith.constant 1.000000e+00 : f32
      %28 = vector.broadcast %cst_22 : f32 to vector<2x32xf32>
      %29 = arith.addf %28, %27 : vector<2x32xf32>
      %30 = arith.divf %28, %29 : vector<2x32xf32>
      %c0_23 = arith.constant 0 : index
      %c0_24 = arith.constant 0 : index
      %31 = vector.load %arg7[%c0_23, %c0_24] : memref<2x32xf32, #tpu.memory_space<vmem>>, vector<2x32xf32>
      tpu.vector_store %arg7[%c0_23, %c0_24], %30 {strides = array<i32>} : memref<2x32xf32, #tpu.memory_space<vmem>>, vector<2x32xf32>,
    } else {
    }
    return
  }
  func.func @transform_0(%arg0: i32, %arg1: i32) -> (i32, i32, i32) {
    %c0_i32 = arith.constant 0 : i32
    %c0_i32_0 = arith.constant 0 : i32
    return %arg0, %c0_i32, %arg1 : i32, i32, i32
  }
  func.func @transform_1(%arg0: i32, %arg1: i32) -> (i32, i32) {
    %c0_i32 = arith.constant 0 : i32
    %c0_i32_0 = arith.constant 0 : i32
    %c0_i32_1 = arith.constant 0 : i32
    return %c0_i32, %c0_i32_0 : i32, i32
  }
  func.func @transform_2(%arg0: i32, %arg1: i32) -> (i32, i32) {
    %c0_i32 = arith.constant 0 : i32
    %c0_i32_0 = arith.constant 0 : i32
    %c0_i32_1 = arith.constant 0 : i32
    return %c0_i32, %c0_i32_0 : i32, i32
  }
  func.func @transform_3(%arg0: i32, %arg1: i32) -> (i32, i32) {
    %c0_i32 = arith.constant 0 : i32
    %c0_i32_0 = arith.constant 0 : i32
    %c0_i32_1 = arith.constant 0 : i32
    return %c0_i32, %c0_i32_0 : i32, i32
  }
  func.func @transform_4(%arg0: i32, %arg1: i32) -> (i32, i32) {
    %c0_i32 = arith.constant 0 : i32
    %c0_i32_0 = arith.constant 0 : i32
    %c0_i32_1 = arith.constant 0 : i32
    return %c0_i32, %c0_i32_0 : i32, i32
  }
  func.func @transform_5(%arg0: i32, %arg1: i32) -> (i32, i32) {
    %c0_i32 = arith.constant 0 : i32
    %c0_i32_0 = arith.constant 0 : i32
    return %arg0, %c0_i32 : i32, i32
  }
}

</mosaic_0001>

<bundles_post_ra>
// kernel: tpu_custom_call.1
= control target key start
LH: loop header
LB: loop body
LE: loop exit
PB: predicated region body
PF: predicated region fallthrough
CT: control target
= control target key end

     0   :  { %10 = vsyncpa [#allocation4], 0  ;;  %s1049_s0 = inlined_call_operand.hbm [shape: f32[2,32,256], index: 0, kind: input, shape index: {}]   ;;  %s1050_s1 = inlined_call_operand.vmem [shape: f32[32,2], index: 1, kind: input, shape index: {}]   ;;  %s1051_s2 = inlined_call_operand.vmem [shape: f32[1,2], index: 2, kind: input, shape index: {}]   ;;  %s1052_s3 = inlined_call_operand.vmem [shape: f32[2,32], index: 3, kind: input, shape index: {}]   ;;  %s1053_s4 = inlined_call_operand.vmem [shape: f32[1,32], index: 4, kind: input, shape index: {}]   ;;  %s1054_s5 = inlined_call_operand.hbm [shape: f32[2,32], index: 5, kind: output, shape index: {}]  }
   0x1   :  { %12 = vsyncpa [#allocation4 + $0x1], 0 }
   0x2   :  { %13 = vsyncpa [#allocation5], 0  ;;  %s873_s18 = smov 0   ;;  %s875_s19 = smov 0  }
   0x3   :  { %s877_s20 = smov 0   ;;  %s879_s21 = smov 0  }
   0x4   :  { %s881_s22 = smov 0   ;;  %s883_s23 = smov 0  }
   0x5 LB: > { %s601_s24 = sadd.s32 4294967295, %s832_s23   ;;  %s28_s25 = sadd.s32 1, %s828_s22  ;;  %s832_s23 = sphi %s883_s23, %s19_s23   ;;  %s828_s22 = sphi %s881_s22, %s1064_s22   ;;  %s824_s21 = sphi %s879_s21, %s1063_s21   ;;  %s820_s20 = sphi %s877_s20, %s1062_s20   ;;  %s816_s19 = sphi %s875_s19, %s1061_s19   ;;  %s812_s18 = sphi %s873_s18, %s1060_s18  }
   0x6   : > { %p29_p0 = scmp.ge.s32.totalorder %s28_s25, 2  ;;  %s40_s26 = sadd.s32 1, %s820_s20 }
   0x7   : > { %p47_p1 = scmp.ne.s32.totalorder %s820_s20, %s816_s19  ;;  %p48_p2 = scmp.eq.s32.totalorder %s832_s23, 0 }
   0x8   : > { %s1066_s25 = smov (%p29_p0, %s28_s25), 0  ;;  %p53_p4 = scmp.ne.s32.totalorder %s816_s19, %s812_s18 }
   0x9   : > { %p909_p3 = por %p48_p2, %p47_p1  ;;  %s36_s28 = ssub.s32 %s828_s22, %s1066_s25 }
   0xa   : > { %p54_p5 = scmp.eq.s32.totalorder %s601_s24, 0  ;;  %p38_p6 = scmp.eq.s32.totalorder %s36_s28, 0 }
   0xb   : > { %p659_p8 = scmp.lt.s32.totalorder %s832_s23, 2  ;;  %s199_s6 = sand.u32 1, %s820_s20  }
   0xc   : > { %p918_p7 = por %p54_p5, %p53_p4  ;;  %s605_s7 = sshll.u32 %s828_s22, 7 }
   0xd   : > { %s924_s30 = scalar_select %p38_p6, %s820_s20, %s40_s26  }
   0xe   : > { %s604_s8 = sshll.u32 %s199_s6, 6  ;;  %s931_s11 = scalar_lea.hbm %s1049_s0, %s605_s7 }
   0xf   : > { %s203_s12 = scalar_lea.vmem [#allocation3], %s604_s8  ;;  %p935_p9 = pnand %p659_p8, %p909_p3 }
  0x10   : > { %s212_s13 = sshll.u32 %s203_s12, 4  ;;  %s942_s15 = scalar_lea.sflag [#allocation4], %s199_s6  ;;  %s939_s13 = int_to_ptr.vmem [resolvable:$true] %s212_s13 }
  0x11   : > { %s722_s16 = scalar_lea.hbm %s931_s11, 1024  ;;  %p724_p12 = pneg %p935_p9 }
  0x12   : > { %p723_p11 = scmp.ne.s32.totalorder %s931_s11, %s722_s16  ;;  %s727_s26 = scalar_lea.hbm %s1049_s0, 2048 }
  0x13   : > { %p728_p1 = scmp.lt.u32.totalorder %s931_s11, %s1049_s0  ;;  %p729_p2 = scmp.lt.u32.totalorder %s727_s26, %s722_s16 }
  0x14   : > { %p725_p13 = pnand %p724_p12, %p723_p11  ;;  %p731_p4 = scmp.lt.u32.totalorder %s722_s16, %s931_s11 }
  0x15   : > { %p730_p3 = por %p729_p2, %p728_p1 }
  0x16   : > { %p726_p0 = pneg %p725_p13 }
  0x17   : > { %p732_p5 = por %p731_p4, %p730_p3 }
  0x19   : > { %p733_p6 = pnand %p732_p5, %p726_p0 }
  0x1b   : > { %736 = shalt.err (!%p733_p6)
}
  0x1c   : > { %s737_s6 = scalar_lea.vmem %s939_s13, 1024  ;;  %s834_s7 = smov [#allocation3]  }
  0x1d   : > { %p738_p8 = scmp.ne.s32.totalorder %s939_s13, %s737_s6  ;;  %s742_s8 = sshll.u32 %s834_s7, 4  ;;  %s743_s8 = int_to_ptr.vmem [resolvable:$false] %s742_s8 }
  0x1e   : > { %s744_s9 = scalar_lea.vmem %s743_s8, 2048  ;;  %p745_p10 = scmp.lt.s32.totalorder %s939_s13, %s743_s8 }
  0x1f   : > { %p740_p11 = pnand %p738_p8, %p724_p12  ;;  %p746_p1 = scmp.lt.s32.totalorder %s744_s9, %s737_s6 }
  0x21   : > { %p741_p13 = pneg %p740_p11  ;;  %p747_p2 = por %p746_p1, %p745_p10 }
  0x23   : > { %p748_p3 = pnand %p747_p2, %p741_p13 }
  0x25   : > { %751 = shalt.err (!%p748_p3)
}
  0x26   : > { %s835_s10 = smov 256   ;;  %s836_s12 = smov 128  }
  0x27   : > { %s837_s16 = smov 8   ;;  %p220_p12 = scmp.lt.s32.totalorder %s832_s23, 3 }
  0x28   : > { %658 = dma.hbm_to_vmem [thread:$0]  (!%p935_p9), %s931_s11, 1024, %s939_s13, %s942_s15, %s835_s10, %s836_s12, %s837_s16  }
  0x29   : > { %p1058_p0 = scmp.ge.s32.totalorder %s832_s23, 1 }
  0x2b   : > { %p221_p4 = pnand %p1058_p0, %p220_p12 }
  0x2c   : > { %s226_s17 = sand.u32 (!%p221_p4), 1, %s816_s19  }
  0x2d   : > { %224 = sbr.rel (%p221_p4) target bundleno = 716 (0x2cc), region = 40  ;;  %s607_s18 = sshll.u32 (!%p221_p4), %s226_s17, 6 }
  0x2e   : > { %s227_s26 = scalar_lea.sflag (!%p221_p4), [#allocation4], %s226_s17  ;;  %s230_s27 = scalar_lea.vmem (!%p221_p4), [#allocation3], %s607_s18 }
  0x34   : > { %803 = dma.done.wait (%p918_p7), %s227_s26, 1024  }
  0x35   : > { %805 = vsyncadd (%p918_p7), %s227_s26, 4294966272  ;;  %p608_p10 = scmp.ne.s32.totalorder %s824_s21, 0 }
  0x36   : > { %vm257_vm0 = vcmask (!%p608_p10), 254976   ;;  %v838_v0 = vmov (!%p608_p10), 0.0  }
  0x37   : > { %256 = sbr.rel (%p608_p10) target bundleno = 62 (0x3e), region = 48  ;;  %258 = vst.msk [vmem:[#allocation2] sm:$0x3] (!%p608_p10), %vm257_vm0, %v838_v0 }
  0x3e PF: > { %v263_v1 = vld [vmem:[%s230_s27 + $0x20] sm:$0xff]  ;;  %v264_v3 = vld [vmem:[%s230_s27 + $0x28] sm:$0xff]  ;;  %v265_v5 = vld [vmem:[%s230_s27 + $0x30] sm:$0xff]  ;;  %v292_v9 = vlaneseq  ;;  %vm303_vm1 = vcmask 130112   ;;  %vm310_vm2 = vcmask 195712   ;;  %vm317_vm3 = vcmask 261312  }
  0x3f   : > { %v259_v2 = vld [vmem:[%s230_s27] sm:$0xff]  ;;  %276 = vadd.xlane.f32.xlu1 %v263_v1  ;;  %v260_v4 = vld [vmem:[%s230_s27 + $0x8] sm:$0xff]  ;;  %v261_v6 = vld [vmem:[%s230_s27 + $0x10] sm:$0xff]  ;;  %vm338_vm4 = vcmask 1041409   ;;  %vm342_vm5 = vcmask 254976   ;;  %p609_p7 = scmp.ne.s32.totalorder %s824_s21, 1 }
  0x40   : > { %268 = vadd.xlane.f32.xlu0 %v259_v2  ;;  %v266_v7 = vld [vmem:[%s230_s27 + $0x38] sm:$0xff]  ;;  %v293_v10 = vand.u32 127, %v292_v9  ;;  %v295_v15 = vshrl.u32 %v292_v9, 7  ;;  %v351_v45 = vld [vmem:[%s1050_s1 + $0x8] sm:$0xff] (!%p609_p7)  ;;  %v352_v46 = vld [vmem:[%s1050_s1 + $0x10] sm:$0xff] (!%p609_p7)  ;;  %v839_v47 = vmov (!%p609_p7), 0.0|0.0  }
  0x41   : > { %v262_v8 = vld [vmem:[%s230_s27 + $0x18] sm:$0xff]  ;;  %643 = vmatprep.subr.bf16.mxu0 (!%p609_p7), %v839_v47  ;;  %vm840_vm6 = vmmov (!%p609_p7), 0   ;;  %v841_v50 = vmov (!%p609_p7), 0.0   ;;  %vm361_vm7 = vcmask (!%p609_p7), 261120   ;;  %vm448_vm8 = vcmask (!%p609_p7), 1041408  }
  0x42   : > { %v298_v13 = vadd.s32 4294967288, %v293_v10  ;;  %v305_v14 = vadd.s32 4294967280, %v293_v10  ;;  %v312_v19 = vadd.s32 4294967272, %v293_v10  ;;  %v296_v21 = vsub.s32 %v293_v10, %v295_v15  ;;  %v267_v39 = vld [vmem:[#allocation2] sm:$0x3]  ;;  %v353_v49 = vld [vmem:[%s1050_s1 + $0x18] sm:$0xff] (!%p609_p7)  ;;  %635 = vmatprep.mubr.msk.f32.mxu0 (!%p609_p7), %vm840_vm6, %v841_v50  ;;  %638 = vmatprep.subr.mxu1 (!%p609_p7), %v841_v50 }
  0x43   : > { %278 = vadd.xlane.f32.xlu1 %v264_v3  ;;  %v350_v44 = vld [vmem:[%s1050_s1] sm:$0xff] (!%p609_p7)  ;;  %640 = vmatprep.mubr.msk.f32.mxu1 (!%p609_p7), %vm840_vm6, %v841_v50  ;;  %v647_v51 = vpack.c.bf16 (!%p609_p7), %v353_v49, %v352_v46  ;;  %vm444_vm9 = vcmask (!%p609_p7), 15360  }
  0x44   : > { %270 = vadd.xlane.f32.xlu0 %v260_v4  ;;  %v301_v18 = vsub.s32 %v298_v13, %v295_v15  ;;  %v308_v20 = vsub.s32 %v305_v14, %v295_v15  ;;  %v315_v26 = vsub.s32 %v312_v19, %v295_v15  ;;  %v644_v48 = vpack.c.bf16 (!%p609_p7), %v351_v45, %v350_v44  ;;  %v436_v54 = vld [vmem:[%s1052_s3] sm:$0x3] (!%p609_p7) }
  0x45   : > { %639 = vmatpush3.msk.msra.mxu1 (!%p609_p7), %vm448_vm8, %v436_v54  ;;  %v610_v55 = vld [vmem:[%s1051_s2] ss:$0 sm:$0xff] (!%p609_p7) }
  0x46   : > { %645 = vmatpush3.bf16.msra.mxu0 (!%p609_p7), %v644_v48  ;;  %v612_v60 = vld [vmem:[%s1053_s4] ss:$0 sm:$0xff] (!%p609_p7) }
  0x47   : > { %280 = vadd.xlane.f32.xlu1 %v265_v5  ;;  %646 = vmatprep.subr.bf16.mxu0 (!%p609_p7), %v839_v47 }
  0x48   : > { %272 = vadd.xlane.f32.xlu0 %v261_v6 }
  0x4a   : > { %648 = vmatpush3.bf16.msra.mxu0 (!%p609_p7), %v647_v51 }
  0x4b   : > { %282 = vadd.xlane.f32.xlu1 %v266_v7 }
  0x4c   : > { %274 = vadd.xlane.f32.xlu0 %v262_v8 }
  0xcc   : > { %v277_v11 = vpop.xlane.xlu1 %276 }
  0xcd   : > { %v269_v12 = vpop.xlane.xlu0 %268  ;;  %v322_v29 = vrot.slane %v277_v11, %v296_v21 }
  0xce   : > { %v297_v30 = vrot.slane %v269_v12, %v296_v21 }
  0xd0   : > { %v279_v16 = vpop.xlane.xlu1 %278 }
  0xd1   : > { %v271_v17 = vpop.xlane.xlu0 %270  ;;  %v326_v24 = vrot.slane %v279_v16, %v301_v18 }
  0xd2   : > { %v302_v25 = vrot.slane %v271_v17, %v301_v18 }
  0xd3   : > { %v327_v33 = vsel %vm303_vm1, %v326_v24, %v322_v29 }
  0xd4   : > { %v281_v22 = vpop.xlane.xlu1 %280  ;;  %v304_v34 = vsel %vm303_vm1, %v302_v25, %v297_v30 }
  0xd5   : > { %v273_v23 = vpop.xlane.xlu0 %272  ;;  %v331_v27 = vrot.slane %v281_v22, %v308_v20 }
  0xd6   : > { %v309_v28 = vrot.slane %v273_v23, %v308_v20 }
  0xd7   : > { %v332_v37 = vsel %vm310_vm2, %v331_v27, %v327_v33 }
  0xd8   : > { %v283_v31 = vpop.xlane.xlu1 %282  ;;  %v311_v38 = vsel %vm310_vm2, %v309_v28, %v304_v34 }
  0xd9   : > { %v275_v32 = vpop.xlane.xlu0 %274  ;;  %v336_v35 = vrot.slane %v283_v31, %v315_v26 }
  0xda   : > { %v316_v36 = vrot.slane %v275_v32, %v315_v26  ;;  %347 = sbr.rel (%p609_p7) target bundleno = 691 (0x2b3), region = 52 }
  0xdb   : > { %v337_v40 = vsel %vm317_vm3, %v336_v35, %v332_v37 }
  0xdc   : > { %v318_v41 = vsel %vm317_vm3, %v316_v36, %v311_v38 }
  0xdd   : > { %v339_v42 = vsel %vm338_vm4, %v337_v40, %v318_v41 }
  0xde   : > { %v341_v43 = vadd.f32 %v339_v42, %v267_v39 }
  0xe0   : > { %343 = vst.msk [vmem:[#allocation2] sm:$0x3] %vm342_vm5, %v341_v43 }
  0xe7   : > { %v348_v52 = vld [vmem:[#allocation2] sm:$0x3] }
  0xe8   : > { %v349_v53 = vmul.f32 0.00390625, %v348_v52 }
  0xea   : > { %636 = vmatmul.mubr.msk.f32.vlgmr.msra.gmra.mrb[0].mxu0 %vm361_vm7, %v349_v53 }
 0x1bd   : > { %v431_v56 = vpop.f32.mrb[0].mxu0 }
 0x1be   : > { %v432_v57 = vadd.f32 %v610_v55, %v431_v56  ;;  %v637_v58 = vpop.f32.mrb[1].mxu0 }
 0x1c0   : > { %v435_v59 = vmax.f32 %v432_v57, 0.0 }
 0x1c2   : > { %641 = vmatmul.mubr.msk.f32.vlgmr.msra.gmra.mrb[0].mxu1 %vm444_vm9, %v435_v59 }
 0x295   : > { %v518_v61 = vpop.f32.mrb[0].mxu1 }
 0x296   : > { %v519_v62 = vadd.f32 %v612_v60, %v518_v61  ;;  %v642_v63 = vpop.f32.mrb[1].mxu1 }
 0x298   : > { %v615_v0 = vmul.f32 -1.442695, %v519_v62 }
 0x29a   : > { %718 = vpow2.f32 %v615_v0 }
 0x2a4   : > { %v719_v1 = vpop.eup %718 }
 0x2a5   : > { %v525_v2 = vadd.f32 1.0, %v719_v1 }
 0x2a7   : > { %720 = vrcp.f32 %v525_v2 }
 0x2b1   : > { %v721_v3 = vpop.eup %720 }
 0x2b2   : > { %528 = vst.msk [vmem:[#allocation6] sm:$0x3] %vm342_vm5, %v721_v3 }
 0x2b3 PF: > { %p1005_p9 = scmp.eq.s32.totalorder %s601_s24, 1  ;;  %s842_s18 = smov [#allocation6]  }
 0x2b4   : > { %s538_s26 = sshll.u32 %s842_s18, 4  ;;  %s539_s26 = int_to_ptr.vmem [resolvable:$true] %s538_s26 }
 0x2b5   : > { %s752_s27 = scalar_lea.vmem %s539_s26, 32  ;;  %p759_p11 = scmp.lt.s32.totalorder %s539_s26, %s539_s26 }
 0x2b6   : > { %p753_p5 = scmp.ne.s32.totalorder %s539_s26, %s752_s27  ;;  %p760_p13 = scmp.lt.s32.totalorder %s752_s27, %s752_s27 }
 0x2b8   : > { %p754_p6 = pnand %p753_p5, %p1005_p9  ;;  %p761_p1 = por %p760_p13, %p759_p11 }
 0x2ba   : > { %p755_p8 = pneg %p754_p6 }
 0x2bc   : > { %p762_p2 = pnand %p761_p1, %p755_p8 }
 0x2be   : > { %765 = shalt.err (!%p762_p2)
}
 0x2bf   : > { %s766_s24 = scalar_lea.hbm %s1054_s5, 32 }
 0x2c0   : > { %p767_p3 = scmp.ne.s32.totalorder %s1054_s5, %s766_s24  ;;  %p772_p4 = scmp.lt.u32.totalorder %s766_s24, %s1054_s5 }
 0x2c2   : > { %p768_p12 = pnand %p767_p3, %p1005_p9 }
 0x2c4   : > { %p769_p0 = pneg %p768_p12 }
 0x2c6   : > { %p774_p10 = pnand %p772_p4, %p769_p0 }
 0x2c8   : > { %777 = shalt.err (!%p774_p10)
}
 0x2c9   : > { %652 = dma.vmem_to_hbm [thread:$0]  (%p1005_p9), %s539_s26, 32, %s1054_s5, [#allocation5]  }
 0x2ca   : > { %807 = dma.done.wait (%p1005_p9), [#allocation5], 32  }
 0x2cb   : > { %809 = vsyncadd (%p1005_p9), [#allocation5], 4294967264 }
 0x2cc PF: > { %s19_s23 = sadd.s32 1, %s832_s23   ;;  %s1060_s18 = smov %s816_s19 }
 0x2cd   : > { %p16_p7 = scmp.ge.s32.totalorder %s19_s23, 4   ;;  %s1061_s19 = smov %s820_s20 }
 0x2ce   : > { %s1062_s20 = smov %s924_s30  ;;  %s1063_s21 = smov %s828_s22 }
 0x2cf   : > { %s1064_s22 = smov %s1066_s25  ;;  %18 = sbr.rel (!%p16_p7) target bundleno = 5 (0x5), region = 86 }
 0x2d6   :  { %551 = vsyncpa [#allocation4], 1 }
 0x2d7   :  { %553 = vsyncpa [#allocation4 + $0x1], 1 }
 0x2d8   :  { %554 = vsyncpa [#allocation5], 1 }
 0x2d9   :  { %556 = vsyncpa [#allocation5 + $0x1], 1 }

</bundles_post_ra>
